<compile_context>
chip_gen: v7x
topology: tpu7x:2x2x1
jax: 0.10.0
libtpu: 0.0.40
codegen_flags: <defaults>
</compile_context>

<pallas_src>
from functools import partial
from typing import Tuple

import jax
import jax.numpy as jnp
from jax.experimental import pallas as pl
from jax.experimental.pallas import tpu as pltpu


def _compute_padding(kernel_size: Tuple[int, int]):
    """Same convention as kornia.filters.filter2d._compute_padding (H then W)."""
    pads = []
    for k in kernel_size:  # (ky, kx)
        computed = k // 2
        front = computed - 1 if k % 2 == 0 else computed
        pads.append((front, computed))
    return pads  # [(pad_top, pad_bottom), (pad_left, pad_right)]


def _box_blur_kernel(x_ref, o_ref, pad_ref, *,
                     ky: int, kx: int, H: int, W: int,
                     pad_t: int, pad_b: int, pad_l: int, pad_r: int,
                     mode: str, scale: float):
    """Box blur of TB image planes.

    x_ref   : (TB, H, W)            unpadded input planes (VMEM)
    o_ref   : (TB, H, W)            output planes (VMEM)
    pad_ref : (TB, Hp, Wp) float32  scratch: padded planes (Hp=H+ky-1, Wp=W+kx-1)
    """
    tb = x_ref.shape[0]
    Hp = H + pad_t + pad_b
    Wp = W + pad_l + pad_r

    xf = x_ref[...].astype(jnp.float32)          # single load + single cast

    # ---- interior (one store) -----------------------------------------------
    pad_ref[:, pad_t:pad_t + H, pad_l:pad_l + W] = xf

    # ---- top / bottom borders over interior columns (H padded before W) -----
    if pad_t:
        if mode == "constant":
            pad_ref[:, 0:pad_t, pad_l:pad_l + W] = (
                jnp.zeros((tb, pad_t, W), jnp.float32))
        elif mode == "replicate":
            pad_ref[:, 0:pad_t, pad_l:pad_l + W] = (
                jnp.broadcast_to(xf[:, 0:1, :], (tb, pad_t, W)))
        elif mode == "circular":
            pad_ref[:, 0:pad_t, pad_l:pad_l + W] = xf[:, H - pad_t:H, :]
        else:  # reflect: reversed row order -> pad_t single-row stores (<=2)
            for i in range(pad_t):
                src = pad_t - i
                pad_ref[:, i:i + 1, pad_l:pad_l + W] = xf[:, src:src + 1, :]
    if pad_b:
        r0 = pad_t + H
        if mode == "constant":
            pad_ref[:, r0:r0 + pad_b, pad_l:pad_l + W] = (
                jnp.zeros((tb, pad_b, W), jnp.float32))
        elif mode == "replicate":
            pad_ref[:, r0:r0 + pad_b, pad_l:pad_l + W] = (
                jnp.broadcast_to(xf[:, H - 1:H, :], (tb, pad_b, W)))
        elif mode == "circular":
            pad_ref[:, r0:r0 + pad_b, pad_l:pad_l + W] = xf[:, 0:pad_b, :]
        else:  # reflect
            for i in range(pad_b):
                src = H - 2 - i
                pad_ref[:, r0 + i:r0 + i + 1, pad_l:pad_l + W] = (
                    xf[:, src:src + 1, :])

    # ---- left / right borders over the FULL padded height (corners come from
    #      the already H-padded rows, matching jnp.pad / torch F.pad) ----------
    if pad_l:
        if mode == "constant":
            pad_ref[:, :, 0:pad_l] = jnp.zeros((tb, Hp, pad_l), jnp.float32)
        elif mode == "replicate":
            col = pad_ref[:, :, pad_l:pad_l + 1]
            pad_ref[:, :, 0:pad_l] = jnp.broadcast_to(col, (tb, Hp, pad_l))
        elif mode == "circular":
            pad_ref[:, :, 0:pad_l] = pad_ref[:, :, W:W + pad_l]
        else:  # reflect: reversed column order -> pad_l single-column stores
            for j in range(pad_l):
                c = pad_l + (pad_l - j)
                pad_ref[:, :, j:j + 1] = pad_ref[:, :, c:c + 1]
    if pad_r:
        c0 = pad_l + W
        if mode == "constant":
            pad_ref[:, :, c0:c0 + pad_r] = jnp.zeros((tb, Hp, pad_r), jnp.float32)
        elif mode == "replicate":
            col = pad_ref[:, :, c0 - 1:c0]
            pad_ref[:, :, c0:c0 + pad_r] = jnp.broadcast_to(col, (tb, Hp, pad_r))
        elif mode == "circular":
            pad_ref[:, :, c0:c0 + pad_r] = pad_ref[:, :, pad_l:pad_l + pad_r]
        else:  # reflect
            for j in range(pad_r):
                c = pad_l + (W - 2 - j)
                pad_ref[:, :, c0 + j:c0 + j + 1] = pad_ref[:, :, c:c + 1]

    # ---- separable box sum: load padded tile once, accumulate in vregs ------
    xp = pad_ref[...]                            # (tb, Hp, Wp), single VMEM load
    hacc = xp[:, :, 0:W]
    for dx in range(1, kx):                      # lane-shifted value adds
        hacc = hacc + xp[:, :, dx:dx + W]
    acc = hacc[:, 0:H, :]
    for dy in range(1, ky):                      # sublane-shifted value adds
        acc = acc + hacc[:, dy:dy + H, :]
    if scale != 1.0:
        acc = acc * scale
    o_ref[...] = acc.astype(o_ref.dtype)         # single store per tile


def _round_up(v: int, m: int) -> int:
    return -(-v // m) * m


def _sublane_granule(itemsize: int) -> int:
    # 8 sublanes per vreg tile for 32-bit types; packed dtypes need more rows.
    return 8 * max(1, 4 // max(1, itemsize))


def _vmem_capacity_bytes() -> int:
    """Per-TensorCore VMEM capacity; conservative fallback if the query fails."""
    try:
        info = pltpu.get_tpu_info()
        cap = int(getattr(info, "vmem_capacity_bytes", 0))
        if cap > 0:
            return cap
    except Exception:
        pass
    return 64 * 1024 * 1024  # assume the smallest (v7x-class) VMEM


def _choose_tb(N: int, cap: int, want_multi_steps: bool):
    """Pick planes-per-step; optionally pad N up instead of degenerating."""
    cap = max(1, min(N, cap))
    if want_multi_steps and N >= 2:
        cap = min(cap, max(1, N // 2))   # keep >=2 grid steps (2 TensorCores)
    divisors = [d for d in range(1, cap + 1) if N % d == 0]
    tb = max(divisors)
    if want_multi_steps:
        even = [d for d in divisors if (N // d) % 2 == 0]
        if even:
            tb = max(even)               # prefer an even number of steps
    # No divisor uses even half of the allowed block (e.g. prime N): pad N up.
    if tb * 2 <= cap and cap > 1:
        return cap, (-N) % cap
    return tb, 0


@partial(jax.jit, static_argnames=("kernel_size", "border_type", "normalized"))
def box_blur(x: jnp.ndarray,
             kernel_size: Tuple[int, int] = (3, 3),
             border_type: str = "reflect",
             normalized: bool = True) -> jnp.ndarray:
    """Box blur of an NCHW image, matching kornia.filters.box_blur semantics."""
    B, C, H, W = x.shape
    ky, kx = kernel_size
    (pad_t, pad_b), (pad_l, pad_r) = _compute_padding((ky, kx))

    if border_type not in ("constant", "reflect", "replicate", "circular"):
        raise ValueError(f"Unsupported border_type: {border_type}")
    if border_type == "reflect" and (max(pad_t, pad_b) > H - 1 or
                                     max(pad_l, pad_r) > W - 1):
        raise ValueError("reflect padding requires kernel//2 <= dim-1")
    if border_type == "circular" and (max(pad_t, pad_b) > H or
                                      max(pad_l, pad_r) > W):
        raise ValueError("circular padding requires kernel//2 <= dim")

    N = B * C
    Hp, Wp = H + pad_t + pad_b, W + pad_l + pad_r
    scale = 1.0 / float(ky * kx) if normalized else 1.0
    x2 = x.reshape(N, H, W)

    # --- per-generation VMEM budget (v5e/v6e: 128 MiB, 1 TC; v7x: 64 MiB, 2 TCs)
    vmem_cap = _vmem_capacity_bytes()
    if vmem_cap >= 100 * 1024 * 1024:
        vmem_limit = 96 * 1024 * 1024    # v5e / v6e: plenty of headroom
        budget = 64 * 1024 * 1024
        want_multi_steps = False         # single TensorCore: fewer, bigger steps
    else:
        vmem_limit = 48 * 1024 * 1024    # v7x-class: leave headroom out of 64 MiB
        budget = 28 * 1024 * 1024
        want_multi_steps = True          # 2 TensorCores: keep >=2 (even) steps

    # --- per-plane VMEM footprint with (8,128) vreg-tile padding --------------
    itemsize = jnp.dtype(x.dtype).itemsize
    sg = _sublane_granule(itemsize)
    io_plane = _round_up(H, sg) * _round_up(W, 128) * itemsize
    pad_plane = _round_up(Hp, 8) * _round_up(Wp, 128) * 4
    # double-buffered input + double-buffered output + padded scratch
    # + headroom for the value accumulators if they spill out of vregs.
    per_plane = 4 * io_plane + 3 * pad_plane
    tb_cap = max(1, budget // per_plane)

    tb, n_extra = _choose_tb(N, tb_cap, want_multi_steps)
    if n_extra:
        x2 = jnp.pad(x2, ((0, n_extra), (0, 0), (0, 0)))
    Ntot = N + n_extra

    kernel = partial(_box_blur_kernel, ky=ky, kx=kx, H=H, W=W,
                     pad_t=pad_t, pad_b=pad_b, pad_l=pad_l, pad_r=pad_r,
                     mode=border_type, scale=scale)

    out = pl.pallas_call(
        kernel,
        out_shape=jax.ShapeDtypeStruct((Ntot, H, W), x.dtype),
        grid_spec=pltpu.PrefetchScalarGridSpec(
            num_scalar_prefetch=0,
            grid=(Ntot // tb,),
            in_specs=[pl.BlockSpec((tb, H, W), lambda i: (i, 0, 0))],
            out_specs=pl.BlockSpec((tb, H, W), lambda i: (i, 0, 0)),
            scratch_shapes=[
                pltpu.VMEM((tb, Hp, Wp), jnp.float32),  # padded planes
            ],
        ),
        compiler_params=pltpu.CompilerParams(
            dimension_semantics=("parallel",),
            vmem_limit_bytes=vmem_limit,
        ),
    )(x2)

    if n_extra:
        out = out[:N]
    return out.reshape(B, C, H, W)


class BoxBlur:
    """Minimal JAX analogue of kornia.filters.BoxBlur (stateless, no params)."""

    def __init__(self, kernel_size: Tuple[int, int],
                 border_type: str = "reflect", normalized: bool = True):
        self.kernel_size = kernel_size
        self.border_type = border_type
        self.normalized = normalized

    def __call__(self, x: jnp.ndarray) -> jnp.ndarray:
        return box_blur(x, self.kernel_size, self.border_type, self.normalized)


def _reference_box_blur(x, kernel_size, border_type="reflect", normalized=True):
    """Pure-JAX reference (jnp.pad + shifted-window sum) for verification."""
    B, C, H, W = x.shape
    ky, kx = kernel_size
    (pt, pb), (pwl, pwr) = _compute_padding((ky, kx))
    mode_map = {"constant": "constant", "reflect": "reflect",
                "replicate": "edge", "circular": "wrap"}
    xp = jnp.pad(x, ((0, 0), (0, 0), (pt, pb), (pwl, pwr)),
                 mode=mode_map[border_type])
    acc = jnp.zeros((B, C, H, W), dtype=jnp.float32)
    for dy in range(ky):
        for dx in range(kx):
            acc = acc + xp[:, :, dy:dy + H, dx:dx + W].astype(jnp.float32)
    scale = 1.0 / (ky * kx) if normalized else 1.0
    return (acc * scale).astype(x.dtype)


if __name__ == "__main__":
    key = jax.random.PRNGKey(0)
    x = jax.random.uniform(key, (2, 4, 16, 16), dtype=jnp.float32)

    # Primary case through the module interface.
    blur = BoxBlur((3, 3), border_type="reflect", normalized=True)
    y = jax.block_until_ready(blur(x))
    assert y.shape == x.shape, (y.shape, x.shape)
    y_ref = _reference_box_blur(x, (3, 3), "reflect", True)
    assert jnp.allclose(y, y_ref, atol=1e-5, rtol=1e-5), "mismatch (3,3) reflect"

    # Other border modes / kernel shapes, incl. even kernels (asymmetric pads)
    # with NON-constant borders (per review correctness concern).
    for ks, bt in [((5, 5), "replicate"), ((3, 5), "circular"),
                   ((2, 2), "constant"), ((4, 4), "reflect"),
                   ((2, 3), "replicate"), ((3, 3), "constant")]:
        yk = jax.block_until_ready(box_blur(x, ks, bt, True))
        yr = _reference_box_blur(x, ks, bt, True)
        assert yk.shape == x.shape
        assert jnp.allclose(yk, yr, atol=1e-5, rtol=1e-5), f"mismatch {ks} {bt}"

    print("KERNEL_OK")
</pallas_src>

<mosaic_0001>
module attributes {stable_mosaic.version = 11 : i64} {
  func.func @_box_blur_kernel(%arg0: i32, %arg1: memref<4x16x16xf32, #tpu.memory_space<vmem>>, %arg2: memref<4x16x16xf32, #tpu.memory_space<vmem>>, %arg3: memref<4x18x18xf32, #tpu.memory_space<vmem>>) attributes {dimension_semantics = [#tpu.dimension_semantics<parallel>], iteration_bounds = array<i64: 2>, scalar_prefetch = 0 : i64, scratch_operands = 1 : i64, tpu.core_type = #tpu.core_type<tc>, window_params = [{transform_indices = @transform_0, window_bounds = array<i64: 4, 16, 16>}, {transform_indices = @transform_1, window_bounds = array<i64: 4, 16, 16>}]} {
    %c0 = arith.constant 0 : index
    %c0_0 = arith.constant 0 : index
    %c0_1 = arith.constant 0 : index
    %0 = vector.load %arg1[%c0, %c0_0, %c0_1] : memref<4x16x16xf32, #tpu.memory_space<vmem>>, vector<4x16x16xf32>
    %c0_2 = arith.constant 0 : index
    %c1 = arith.constant 1 : index
    %c1_3 = arith.constant 1 : index
    %1 = vector.load %arg3[%c0_2, %c1, %c1_3] : memref<4x18x18xf32, #tpu.memory_space<vmem>>, vector<4x16x16xf32>
    tpu.vector_store %arg3[%c0_2, %c1, %c1_3], %0 {strides = array<i32>} : memref<4x18x18xf32, #tpu.memory_space<vmem>>, vector<4x16x16xf32>,
    %2 = vector.extract_strided_slice %0 {offsets = [0, 1, 0], sizes = [4, 1, 16], strides = [1, 1, 1]} : vector<4x16x16xf32> to vector<4x1x16xf32>
    %c0_4 = arith.constant 0 : index
    %c0_5 = arith.constant 0 : index
    %c1_6 = arith.constant 1 : index
    %3 = vector.load %arg3[%c0_4, %c0_5, %c1_6] : memref<4x18x18xf32, #tpu.memory_space<vmem>>, vector<4x1x16xf32>
    tpu.vector_store %arg3[%c0_4, %c0_5, %c1_6], %2 {strides = array<i32>} : memref<4x18x18xf32, #tpu.memory_space<vmem>>, vector<4x1x16xf32>,
    %4 = vector.extract_strided_slice %0 {offsets = [0, 14, 0], sizes = [4, 1, 16], strides = [1, 1, 1]} : vector<4x16x16xf32> to vector<4x1x16xf32>
    %c0_7 = arith.constant 0 : index
    %c17 = arith.constant 17 : index
    %c1_8 = arith.constant 1 : index
    %5 = vector.load %arg3[%c0_7, %c17, %c1_8] : memref<4x18x18xf32, #tpu.memory_space<vmem>>, vector<4x1x16xf32>
    tpu.vector_store %arg3[%c0_7, %c17, %c1_8], %4 {strides = array<i32>} : memref<4x18x18xf32, #tpu.memory_space<vmem>>, vector<4x1x16xf32>,
    %c0_9 = arith.constant 0 : index
    %c0_10 = arith.constant 0 : index
    %c2 = arith.constant 2 : index
    %6 = vector.load %arg3[%c0_9, %c0_10, %c2] : memref<4x18x18xf32, #tpu.memory_space<vmem>>, vector<4x18x1xf32>
    %c0_11 = arith.constant 0 : index
    %c0_12 = arith.constant 0 : index
    %c0_13 = arith.constant 0 : index
    %7 = vector.load %arg3[%c0_11, %c0_12, %c0_13] : memref<4x18x18xf32, #tpu.memory_space<vmem>>, vector<4x18x1xf32>
    tpu.vector_store %arg3[%c0_11, %c0_12, %c0_13], %6 {strides = array<i32>} : memref<4x18x18xf32, #tpu.memory_space<vmem>>, vector<4x18x1xf32>,
    %c0_14 = arith.constant 0 : index
    %c0_15 = arith.constant 0 : index
    %c15 = arith.constant 15 : index
    %8 = vector.load %arg3[%c0_14, %c0_15, %c15] : memref<4x18x18xf32, #tpu.memory_space<vmem>>, vector<4x18x1xf32>
    %c0_16 = arith.constant 0 : index
    %c0_17 = arith.constant 0 : index
    %c17_18 = arith.constant 17 : index
    %9 = vector.load %arg3[%c0_16, %c0_17, %c17_18] : memref<4x18x18xf32, #tpu.memory_space<vmem>>, vector<4x18x1xf32>
    tpu.vector_store %arg3[%c0_16, %c0_17, %c17_18], %8 {strides = array<i32>} : memref<4x18x18xf32, #tpu.memory_space<vmem>>, vector<4x18x1xf32>,
    %c0_19 = arith.constant 0 : index
    %c0_20 = arith.constant 0 : index
    %c0_21 = arith.constant 0 : index
    %10 = vector.load %arg3[%c0_19, %c0_20, %c0_21] : memref<4x18x18xf32, #tpu.memory_space<vmem>>, vector<4x18x18xf32>
    %11 = vector.extract_strided_slice %10 {offsets = [0, 0, 0], sizes = [4, 18, 16], strides = [1, 1, 1]} : vector<4x18x18xf32> to vector<4x18x16xf32>
    %12 = vector.extract_strided_slice %10 {offsets = [0, 0, 1], sizes = [4, 18, 16], strides = [1, 1, 1]} : vector<4x18x18xf32> to vector<4x18x16xf32>
    %13 = arith.addf %11, %12 : vector<4x18x16xf32>
    %14 = vector.extract_strided_slice %10 {offsets = [0, 0, 2], sizes = [4, 18, 16], strides = [1, 1, 1]} : vector<4x18x18xf32> to vector<4x18x16xf32>
    %15 = arith.addf %13, %14 : vector<4x18x16xf32>
    %16 = vector.extract_strided_slice %15 {offsets = [0, 0, 0], sizes = [4, 16, 16], strides = [1, 1, 1]} : vector<4x18x16xf32> to vector<4x16x16xf32>
    %17 = vector.extract_strided_slice %15 {offsets = [0, 1, 0], sizes = [4, 16, 16], strides = [1, 1, 1]} : vector<4x18x16xf32> to vector<4x16x16xf32>
    %18 = arith.addf %16, %17 : vector<4x16x16xf32>
    %19 = vector.extract_strided_slice %15 {offsets = [0, 2, 0], sizes = [4, 16, 16], strides = [1, 1, 1]} : vector<4x18x16xf32> to vector<4x16x16xf32>
    %20 = arith.addf %18, %19 : vector<4x16x16xf32>
    %cst = arith.constant 0.111111112 : f32
    %21 = vector.broadcast %cst : f32 to vector<4x16x16xf32>
    %22 = arith.mulf %20, %21 : vector<4x16x16xf32>
    %c0_22 = arith.constant 0 : index
    %c0_23 = arith.constant 0 : index
    %c0_24 = arith.constant 0 : index
    %23 = vector.load %arg2[%c0_22, %c0_23, %c0_24] : memref<4x16x16xf32, #tpu.memory_space<vmem>>, vector<4x16x16xf32>
    tpu.vector_store %arg2[%c0_22, %c0_23, %c0_24], %22 {strides = array<i32>} : memref<4x16x16xf32, #tpu.memory_space<vmem>>, vector<4x16x16xf32>,
    return
  }
  func.func @transform_0(%arg0: i32) -> (i32, i32, i32) {
    %c0_i32 = arith.constant 0 : i32
    %c0_i32_0 = arith.constant 0 : i32
    %c0_i32_1 = arith.constant 0 : i32
    return %arg0, %c0_i32, %c0_i32_0 : i32, i32, i32
  }
  func.func @transform_1(%arg0: i32) -> (i32, i32, i32) {
    %c0_i32 = arith.constant 0 : i32
    %c0_i32_0 = arith.constant 0 : i32
    %c0_i32_1 = arith.constant 0 : i32
    return %arg0, %c0_i32, %c0_i32_0 : i32, i32, i32
  }
}

</mosaic_0001>

<bundles_post_ra>
// kernel: box_blur.1
= control target key start
LH: loop header
LB: loop body
LE: loop exit
PB: predicated region body
PF: predicated region fallthrough
CT: control target
= control target key end

     0   :  { %6 = vsyncpa [#allocation4], 0  ;;  %s1196_s0 = inlined_call_operand.hbm [shape: f32[8,16,16], index: 0, kind: input, shape index: {}]   ;;  %s1197_s1 = inlined_call_operand.hbm [shape: f32[8,16,16], index: 1, kind: output, shape index: {}]  }
   0x1   :  { %8 = vsyncpa [#allocation4 + $0x1], 0 }
   0x2   :  { %9 = vsyncpa [#allocation5], 0 }
   0x3   :  { %11 = vsyncpa [#allocation5 + $0x1], 0  ;;  %s848_s6 = smov 0   ;;  %s850_s7 = smov 0  }
   0x4   :  { %s852_s8 = smov 0   ;;  %s854_s9 = smov 0  }
   0x5 LB: > { %s869_s10 = sadd.s32 4294967295, %s826_s9   ;;  %s656_s11 = sadd.s32 4294967294, %s826_s9   ;;  %s826_s9 = sphi %s854_s9, %s1210_s9   ;;  %s822_s8 = sphi %s852_s8, %s1209_s8   ;;  %s818_s7 = sphi %s850_s7, %s1208_s7   ;;  %s814_s6 = sphi %s848_s6, %s1207_s6  }
   0x6   : > { %s873_s12 = sadd.s32 1, %s826_s9   ;;  %s24_s13 = sadd.s32 1, %s822_s8 }
   0x7   : > { %s21_s14 = ssub.s32 %s826_s9, %s873_s12  ;;  %p31_p0 = scmp.ne.s32.totalorder %s822_s8, %s818_s7 }
   0x8   : > { %p22_p1 = scmp.eq.s32.totalorder %s21_s14, 0  ;;  %p32_p2 = scmp.eq.s32.totalorder %s826_s9, 0 }
   0x9   : > { %p37_p3 = scmp.ne.s32.totalorder %s818_s7, %s814_s6  ;;  %p38_p4 = scmp.eq.s32.totalorder %s869_s10, 0 }
   0xa   : > { %s885_s15 = scalar_select %p22_p1, %s822_s8, %s24_s13  }
   0xb   : > { %p887_p5 = por %p32_p2, %p31_p0  ;;  %p891_p6 = por %p38_p4, %p37_p3 }
   0xc   : > { %p61_p7 = scmp.eq.s32.totalorder %s869_s10, 1  ;;  %p67_p8 = scmp.eq.s32.totalorder %s656_s11, 1 }
   0xd   : > { %p688_p10 = scmp.lt.s32.totalorder %s826_s9, 2  ;;  %s87_s20 = sand.u32 1, %s822_s8  }
   0xe   : > { %p898_p11 = por %p61_p7, %p31_p0  ;;  %p902_p12 = por %p67_p8, %p37_p3 }
   0xf   : > { %s673_s21 = sshll.u32 %s826_s9, 10  ;;  %s659_s22 = sshll.u32 %s87_s20, 6 }
  0x10   : > { %s1201_s18 = scalar_select %p898_p11, 1, 0 }
  0x11   : > { %s1202_s19 = scalar_select %p902_p12, 1, 0 }
  0x12   : > { %s911_s25 = scalar_lea.hbm %s1196_s0, %s673_s21  ;;  %s91_s26 = scalar_lea.vmem [#allocation3], %s659_s22 }
  0x13   : > { %s99_s27 = sshll.u32 %s91_s26, 4  ;;  %p915_p13 = pnand %p688_p10, %p887_p5  ;;  %s919_s27 = int_to_ptr.vmem [resolvable:$true] %s99_s27 }
  0x14   : > { %s921_s29 = scalar_lea.sflag [#allocation4], %s87_s20  ;;  %s730_s30 = scalar_lea.hbm %s911_s25, 1024 }
  0x15   : > { %p731_p0 = scmp.ne.s32.totalorder %s911_s25, %s730_s30  ;;  %p732_p1 = pneg %p915_p13 }
  0x16   : > { %s735_s4 = scalar_lea.hbm %s1196_s0, 2048  ;;  %p736_p4 = scmp.lt.u32.totalorder %s911_s25, %s1196_s0 }
  0x17   : > { %p733_p2 = pnand %p732_p1, %p731_p0  ;;  %p737_p5 = scmp.lt.u32.totalorder %s735_s4, %s730_s30 }
  0x18   : > { %p739_p8 = scmp.lt.u32.totalorder %s730_s30, %s911_s25 }
  0x19   : > { %p734_p3 = pneg %p733_p2  ;;  %p738_p7 = por %p737_p5, %p736_p4 }
  0x1b   : > { %p740_p10 = por %p739_p8, %p738_p7 }
  0x1d   : > { %p741_p9 = pnand %p740_p10, %p734_p3 }
  0x1f   : > { %744 = shalt.err (!%p741_p9)
}
  0x20   : > { %s745_s13 = scalar_lea.vmem %s919_s27, 1024  ;;  %s828_s14 = smov [#allocation3]  }
  0x21   : > { %p746_p0 = scmp.ne.s32.totalorder %s919_s27, %s745_s13  ;;  %s750_s16 = sshll.u32 %s828_s14, 4  ;;  %s751_s16 = int_to_ptr.vmem [resolvable:$false] %s750_s16 }
  0x22   : > { %s752_s20 = scalar_lea.vmem %s751_s16, 2048  ;;  %p753_p11 = scmp.lt.s32.totalorder %s919_s27, %s751_s16 }
  0x23   : > { %p748_p2 = pnand %p746_p0, %p732_p1  ;;  %p754_p4 = scmp.lt.s32.totalorder %s752_s20, %s745_s13 }
  0x25   : > { %p749_p12 = pneg %p748_p2  ;;  %p755_p5 = por %p754_p4, %p753_p11 }
  0x27   : > { %p756_p7 = pnand %p755_p5, %p749_p12 }
  0x29   : > { %759 = shalt.err (!%p756_p7)
}
  0x2a   : > { %s829_s21 = smov 128   ;;  %s830_s22 = smov 8  }
  0x2b   : > { %683 = dma.hbm_to_vmem [thread:$0]  (!%p915_p13), %s911_s25, 1024, %s919_s27, %s921_s29, %s829_s21, %s829_s21, %s830_s22  }
  0x2c   : > { %p663_p9 = scmp.ge.s32.totalorder %s826_s9, 1  ;;  %p107_p1 = scmp.lt.s32.totalorder %s826_s9, 3 }
  0x2e   : > { %p108_p3 = pnand %p663_p9, %p107_p1 }
  0x2f   : > { %s952_s23 = sand.u32 (!%p108_p3), 1, %s818_s7  }
  0x30   : > { %111 = sbr.rel (%p108_p3) target bundleno = 615 (0x267), region = 24  ;;  %s664_s24 = sshll.u32 (!%p108_p3), %s952_s23, 6 }
  0x31   : > { %s114_s26 = scalar_lea.sflag (!%p108_p3), [#allocation4], %s952_s23  ;;  %s117_s30 = scalar_lea.vmem (!%p108_p3), [#allocation3], %s664_s24 }
  0x37   : > { %805 = dma.done.wait (%p891_p6), %s114_s26, 1024  }
  0x38   : > { %807 = vsyncadd (%p891_p6), %s114_s26, 4294966272  ;;  %v138_v0 = vld [vmem:[%s117_s30] sm:$0xff]  ;;  %v140_v1 = vld [vmem:[%s117_s30 + $0x10] sm:$0xff]  ;;  %s831_s25 = smov 1   ;;  %vm178_vm0 = vcmask 138248   ;;  %vm187_vm1 = vcmask 132105  }
  0x39   : > { %154 = vrot.lane.b32.xlu0 %v138_v0, %s831_s25  ;;  %158 = vrot.lane.b32.xlu1 %v140_v1, %s831_s25  ;;  %v139_v2 = vld [vmem:[%s117_s30 + $0x8] sm:$0xff]  ;;  %v141_v3 = vld [vmem:[%s117_s30 + $0x18] sm:$0xff]  ;;  %vm192_vm2 = vcmask 137230   ;;  %s832_s17 = smov 126   ;;  %vm257_vm3 = vcmask 7168   ;;  %vm260_vm4 = vcmask 1024  }
  0x3a   : > { %v142_v4 = vld [vmem:[%s117_s30 + $0x20] sm:$0xff]  ;;  %v143_v5 = vld [vmem:[%s117_s30 + $0x28] sm:$0xff]  ;;  %v145_v6 = vld [vmem:[%s117_s30 + $0x38] sm:$0xff]  ;;  %s833_s27 = smov 2   ;;  %vm331_vm5 = vcmask 146568   ;;  %vm334_vm6 = vcmask 140424  }
  0x3b   : > { %v144_v7 = vld [vmem:[%s117_s30 + $0x30] sm:$0xff]  ;;  %s834_s28 = smov 127   ;;  %vm477_vm7 = vcmask 1046528   ;;  %vm514_vm8 = vcmask 1045504   ;;  %vm559_vm9 = vcmask 130048   ;;  %s1110_s29 = scalar_lea.vmem [#allocation6], %s664_s24 }
  0x3c   : > { %s675_s2 = sshll.u32 %s869_s10, 10  ;;  %s583_s3 = sshll.u32 %s1110_s29, 4  ;;  %s1148_s3 = int_to_ptr.vmem [resolvable:$true] %s583_s3 }
  0x3d   : > { %156 = vrot.lane.b32.xlu0 %v139_v2, %s831_s25  ;;  %160 = vrot.lane.b32.xlu1 %v141_v3, %s831_s25  ;;  %s1146_s11 = scalar_lea.hbm %s1197_s1, %s675_s2  ;;  %s569_s10 = scalar_lea.sflag [#allocation5], %s952_s23 }
  0x3e   : > { %s760_s13 = scalar_lea.vmem %s1148_s3, 1024  ;;  %p1204_p11 = scmp.ne.s32.totalorder %s1201_s18, 0 }
  0x3f   : > { %p761_p6 = scmp.ne.s32.totalorder %s1148_s3, %s760_s13  ;;  %s835_s14 = smov [#allocation6]  }
  0x40   : > { %s764_s16 = sshll.u32 %s835_s14, 4  ;;  %s765_s16 = int_to_ptr.vmem [resolvable:$false] %s764_s16 }
  0x41   : > { %162 = vrot.lane.b32.xlu0 %v142_v4, %s831_s25  ;;  %164 = vrot.lane.b32.xlu1 %v143_v5, %s831_s25  ;;  %p762_p12 = pnand %p761_p6, %p1204_p11  ;;  %s766_s20 = scalar_lea.vmem %s765_s16, 2048 }
  0x42   : > { %p767_p8 = scmp.lt.s32.totalorder %s1148_s3, %s765_s16  ;;  %p768_p10 = scmp.lt.s32.totalorder %s766_s20, %s760_s13 }
  0x43   : > { %p763_p13 = pneg %p762_p12 }
  0x44   : > { %p769_p0 = por %p768_p10, %p767_p8 }
  0x45   : > { %168 = vrot.lane.b32.xlu1 %v145_v6, %s831_s25  ;;  %166 = vrot.lane.b32.xlu0 %v144_v7, %s831_s25 }
  0x46   : > { %p770_p2 = pnand %p769_p0, %p763_p13 }
  0xab   : > { %v155_v8 = vpop.permute.xlu0 %154  ;;  %v159_v9 = vpop.permute.xlu1 %158 }
  0xac   : > { %179 = vst.msk [vmem:[#allocation2 + $0x1] sm:$0xff] %vm178_vm0, %v155_v8  ;;  %181 = vst.msk [vmem:[#allocation2 + $0x19] sm:$0xff] %vm178_vm0, %v159_v9 }
  0xad   : > { %188 = vst.msk [vmem:[#allocation2 - $0x1] sm:$0x2] %vm187_vm1, %v155_v8  ;;  %189 = vst.msk [vmem:[#allocation2 + $0x17] sm:$0x2] %vm187_vm1, %v159_v9 }
  0xaf   : > { %v157_v10 = vpop.permute.xlu0 %156  ;;  %v161_v11 = vpop.permute.xlu1 %160 }
  0xb0   : > { %180 = vst.msk [vmem:[#allocation2 + $0x9] sm:$0xff] %vm178_vm0, %v157_v10  ;;  %182 = vst.msk [vmem:[#allocation2 + $0x21] sm:$0xff] %vm178_vm0, %v161_v11 }
  0xb1   : > { %193 = vst.msk [vmem:[#allocation2 + $0xb] sm:$0x40] %vm192_vm2, %v157_v10  ;;  %194 = vst.msk [vmem:[#allocation2 + $0x23] sm:$0x40] %vm192_vm2, %v161_v11 }
  0xb3   : > { %v163_v13 = vpop.permute.xlu0 %162  ;;  %v165_v14 = vpop.permute.xlu1 %164 }
  0xb4   : > { %v197_v12 = vld [vmem:[#allocation2] sm:$0xff]  ;;  %183 = vst.msk [vmem:[#allocation2 + $0x31] sm:$0xff] %vm178_vm0, %v163_v13  ;;  %184 = vst.msk [vmem:[#allocation2 + $0x39] sm:$0xff] %vm178_vm0, %v165_v14  ;;  %v200_v20 = vld [vmem:[#allocation2 + $0x18] sm:$0xff] }
  0xb5   : > { %221 = vrot.lane.b32.xlu0 %v197_v12, %s832_s17  ;;  %190 = vst.msk [vmem:[#allocation2 + $0x2f] sm:$0x2] %vm187_vm1, %v163_v13 }
  0xb6   : > { %195 = vst.msk [vmem:[#allocation2 + $0x3b] sm:$0x40] %vm192_vm2, %v165_v14 }
  0xb7   : > { %v198_v16 = vld [vmem:[#allocation2 + $0x8] sm:$0xff]  ;;  %v169_v17 = vpop.permute.xlu1 %168  ;;  %v167_v18 = vpop.permute.xlu0 %166  ;;  %v201_v19 = vld [vmem:[#allocation2 + $0x20] sm:$0xff] }
  0xb8   : > { %v199_v15 = vld [vmem:[#allocation2 + $0x10] sm:$0x3]  ;;  %223 = vrot.lane.b32.xlu1 %v198_v16, %s832_s17  ;;  %186 = vst.msk [vmem:[#allocation2 + $0x51] sm:$0xff] %vm178_vm0, %v169_v17  ;;  %185 = vst.msk [vmem:[#allocation2 + $0x49] sm:$0xff] %vm178_vm0, %v167_v18  ;;  %v202_v21 = vld [vmem:[#allocation2 + $0x28] sm:$0x3] }
  0xb9   : > { %225 = vrot.lane.b32.xlu0 %v199_v15, %s832_s17  ;;  %196 = vst.msk [vmem:[#allocation2 + $0x53] sm:$0x40] %vm192_vm2, %v169_v17 }
  0xba   : > { %191 = vst.msk [vmem:[#allocation2 + $0x47] sm:$0x2] %vm187_vm1, %v167_v18 }
  0xbb   : > { %v204_v23 = vld [vmem:[#allocation2 + $0x38] sm:$0xff] }
  0xbc   : > { %227 = vrot.lane.b32.xlu1 %v200_v20, %s832_s17  ;;  %v203_v22 = vld [vmem:[#allocation2 + $0x30] sm:$0xff] }
  0xbd   : > { %229 = vrot.lane.b32.xlu0 %v201_v19, %s832_s17  ;;  %v205_v24 = vld [vmem:[#allocation2 + $0x40] sm:$0x3] }
  0xbf   : > { %v207_v25 = vld [vmem:[#allocation2 + $0x50] sm:$0xff] }
  0xc0   : > { %231 = vrot.lane.b32.xlu1 %v202_v21, %s832_s17  ;;  %v208_v27 = vld [vmem:[#allocation2 + $0x58] sm:$0x3] }
  0xc1   : > { %233 = vrot.lane.b32.xlu0 %v203_v22, %s832_s17  ;;  %v206_v26 = vld [vmem:[#allocation2 + $0x48] sm:$0xff] }
  0xc4   : > { %235 = vrot.lane.b32.xlu1 %v204_v23, %s832_s17 }
  0xc5   : > { %237 = vrot.lane.b32.xlu0 %v205_v24, %s832_s17 }
  0xc8   : > { %239 = vrot.lane.b32.xlu1 %v206_v26, %s832_s17 }
  0xc9   : > { %241 = vrot.lane.b32.xlu0 %v207_v25, %s832_s17 }
  0xcc   : > { %243 = vrot.lane.b32.xlu1 %v208_v27, %s832_s17 }
 0x127   : > { %v222_v28 = vpop.permute.xlu0 %221 }
 0x128   : > { %258 = vst.msk [vmem:[#allocation2] sm:$0xff] %vm257_vm3, %v222_v28 }
 0x12a   : > { %v224_v29 = vpop.permute.xlu1 %223 }
 0x12b   : > { %v226_v30 = vpop.permute.xlu0 %225  ;;  %259 = vst.msk [vmem:[#allocation2 + $0x8] sm:$0xff] %vm257_vm3, %v224_v29 }
 0x12c   : > { %261 = vst.msk [vmem:[#allocation2 + $0x10] sm:$0x3] %vm260_vm4, %v226_v30 }
 0x12e   : > { %v228_v31 = vpop.permute.xlu1 %227 }
 0x12f   : > { %v230_v32 = vpop.permute.xlu0 %229  ;;  %v271_v33 = vld [vmem:[#allocation2] sm:$0xff]  ;;  %262 = vst.msk [vmem:[#allocation2 + $0x18] sm:$0xff] %vm257_vm3, %v228_v31 }
 0x130   : > { %263 = vst.msk [vmem:[#allocation2 + $0x20] sm:$0xff] %vm257_vm3, %v230_v32  ;;  %295 = vrot.lane.b32.xlu0 %v271_v33, %s833_s27 }
 0x132   : > { %v232_v34 = vpop.permute.xlu1 %231  ;;  %v272_v36 = vld [vmem:[#allocation2 + $0x8] sm:$0xff] }
 0x133   : > { %v234_v35 = vpop.permute.xlu0 %233  ;;  %v273_v37 = vld [vmem:[#allocation2 + $0x10] sm:$0x3]  ;;  %264 = vst.msk [vmem:[#allocation2 + $0x28] sm:$0x3] %vm260_vm4, %v232_v34  ;;  %297 = vrot.lane.b32.xlu1 %v272_v36, %s833_s27 }
 0x134   : > { %265 = vst.msk [vmem:[#allocation2 + $0x30] sm:$0xff] %vm257_vm3, %v234_v35  ;;  %299 = vrot.lane.b32.xlu0 %v273_v37, %s833_s27 }
 0x136   : > { %v236_v38 = vpop.permute.xlu1 %235  ;;  %v274_v40 = vld [vmem:[#allocation2 + $0x18] sm:$0xff] }
 0x137   : > { %v238_v39 = vpop.permute.xlu0 %237  ;;  %v275_v41 = vld [vmem:[#allocation2 + $0x20] sm:$0xff]  ;;  %266 = vst.msk [vmem:[#allocation2 + $0x38] sm:$0xff] %vm257_vm3, %v236_v38  ;;  %301 = vrot.lane.b32.xlu1 %v274_v40, %s833_s27 }
 0x138   : > { %267 = vst.msk [vmem:[#allocation2 + $0x40] sm:$0x3] %vm260_vm4, %v238_v39  ;;  %303 = vrot.lane.b32.xlu0 %v275_v41, %s833_s27 }
 0x13a   : > { %v240_v42 = vpop.permute.xlu1 %239  ;;  %v276_v44 = vld [vmem:[#allocation2 + $0x28] sm:$0x3] }
 0x13b   : > { %v242_v43 = vpop.permute.xlu0 %241  ;;  %v277_v45 = vld [vmem:[#allocation2 + $0x30] sm:$0xff]  ;;  %268 = vst.msk [vmem:[#allocation2 + $0x48] sm:$0xff] %vm257_vm3, %v240_v42  ;;  %305 = vrot.lane.b32.xlu1 %v276_v44, %s833_s27 }
 0x13c   : > { %269 = vst.msk [vmem:[#allocation2 + $0x50] sm:$0xff] %vm257_vm3, %v242_v43  ;;  %307 = vrot.lane.b32.xlu0 %v277_v45, %s833_s27 }
 0x13e   : > { %v244_v46 = vpop.permute.xlu1 %243  ;;  %v278_v47 = vld [vmem:[#allocation2 + $0x38] sm:$0xff] }
 0x13f   : > { %v279_v48 = vld [vmem:[#allocation2 + $0x40] sm:$0x3]  ;;  %270 = vst.msk [vmem:[#allocation2 + $0x58] sm:$0x3] %vm260_vm4, %v244_v46  ;;  %309 = vrot.lane.b32.xlu1 %v278_v47, %s833_s27 }
 0x140   : > { %311 = vrot.lane.b32.xlu0 %v279_v48, %s833_s27 }
 0x142   : > { %v280_v49 = vld [vmem:[#allocation2 + $0x48] sm:$0xff] }
 0x143   : > { %v281_v50 = vld [vmem:[#allocation2 + $0x50] sm:$0xff]  ;;  %313 = vrot.lane.b32.xlu1 %v280_v49, %s833_s27 }
 0x144   : > { %315 = vrot.lane.b32.xlu0 %v281_v50, %s833_s27 }
 0x146   : > { %v282_v51 = vld [vmem:[#allocation2 + $0x58] sm:$0x3] }
 0x147   : > { %317 = vrot.lane.b32.xlu1 %v282_v51, %s833_s27 }
 0x1a2   : > { %v296_v52 = vpop.permute.xlu0 %295 }
 0x1a3   : > { %332 = vst.msk [vmem:[#allocation2] sm:$0xff] %vm331_vm5, %v296_v52 }
 0x1a5   : > { %v298_v53 = vpop.permute.xlu1 %297 }
 0x1a6   : > { %v300_v54 = vpop.permute.xlu0 %299  ;;  %333 = vst.msk [vmem:[#allocation2 + $0x8] sm:$0xff] %vm331_vm5, %v298_v53 }
 0x1a7   : > { %335 = vst.msk [vmem:[#allocation2 + $0x10] sm:$0x3] %vm334_vm6, %v300_v54 }
 0x1a9   : > { %v302_v55 = vpop.permute.xlu1 %301 }
 0x1aa   : > { %v304_v56 = vpop.permute.xlu0 %303  ;;  %v1017_v57 = vld [vmem:[#allocation2] sm:$0xff]  ;;  %336 = vst.msk [vmem:[#allocation2 + $0x18] sm:$0xff] %vm331_vm5, %v302_v55 }
 0x1ab   : > { %337 = vst.msk [vmem:[#allocation2 + $0x20] sm:$0xff] %vm331_vm5, %v304_v56  ;;  %369 = vrot.lane.b32.xlu0 %v1017_v57, %s834_s28 }
 0x1ad   : > { %v306_v58 = vpop.permute.xlu1 %305  ;;  %v346_v60 = vld [vmem:[#allocation2 + $0x8] sm:$0xff] }
 0x1ae   : > { %v308_v59 = vpop.permute.xlu0 %307  ;;  %v347_v61 = vld [vmem:[#allocation2 + $0x10] sm:$0x3]  ;;  %338 = vst.msk [vmem:[#allocation2 + $0x28] sm:$0x3] %vm334_vm6, %v306_v58  ;;  %371 = vrot.lane.b32.xlu1 %v346_v60, %s834_s28 }
 0x1af   : > { %339 = vst.msk [vmem:[#allocation2 + $0x30] sm:$0xff] %vm331_vm5, %v308_v59  ;;  %373 = vrot.lane.b32.xlu0 %v347_v61, %s834_s28 }
 0x1b1   : > { %v310_v62 = vpop.permute.xlu1 %309  ;;  %v1027_v0 = vld [vmem:[#allocation2 + $0x18] sm:$0xff] }
 0x1b2   : > { %v312_v63 = vpop.permute.xlu0 %311  ;;  %v1029_v1 = vld [vmem:[#allocation2 + $0x20] sm:$0xff]  ;;  %340 = vst.msk [vmem:[#allocation2 + $0x38] sm:$0xff] %vm331_vm5, %v310_v62  ;;  %375 = vrot.lane.b32.xlu1 %v1027_v0, %s834_s28 }
 0x1b3   : > { %341 = vst.msk [vmem:[#allocation2 + $0x40] sm:$0x3] %vm334_vm6, %v312_v63  ;;  %377 = vrot.lane.b32.xlu0 %v1029_v1, %s834_s28 }
 0x1b5   : > { %v314_v2 = vpop.permute.xlu1 %313  ;;  %v1037_v4 = vld [vmem:[#allocation2 + $0x28] sm:$0x3] }
 0x1b6   : > { %v316_v3 = vpop.permute.xlu0 %315  ;;  %v1039_v5 = vld [vmem:[#allocation2 + $0x30] sm:$0xff]  ;;  %342 = vst.msk [vmem:[#allocation2 + $0x48] sm:$0xff] %vm331_vm5, %v314_v2  ;;  %379 = vrot.lane.b32.xlu1 %v1037_v4, %s834_s28 }
 0x1b7   : > { %343 = vst.msk [vmem:[#allocation2 + $0x50] sm:$0xff] %vm331_vm5, %v316_v3  ;;  %381 = vrot.lane.b32.xlu0 %v1039_v5, %s834_s28 }
 0x1b9   : > { %v318_v6 = vpop.permute.xlu1 %317  ;;  %v1047_v7 = vld [vmem:[#allocation2 + $0x38] sm:$0xff] }
 0x1ba   : > { %v1049_v8 = vld [vmem:[#allocation2 + $0x40] sm:$0x3]  ;;  %344 = vst.msk [vmem:[#allocation2 + $0x58] sm:$0x3] %vm334_vm6, %v318_v6  ;;  %383 = vrot.lane.b32.xlu1 %v1047_v7, %s834_s28 }
 0x1bb   : > { %385 = vrot.lane.b32.xlu0 %v1049_v8, %s834_s28 }
 0x1bd   : > { %v1056_v9 = vld [vmem:[#allocation2 + $0x48] sm:$0xff] }
 0x1be   : > { %v1058_v10 = vld [vmem:[#allocation2 + $0x50] sm:$0xff]  ;;  %387 = vrot.lane.b32.xlu1 %v1056_v9, %s834_s28 }
 0x1bf   : > { %389 = vrot.lane.b32.xlu0 %v1058_v10, %s834_s28 }
 0x1c1   : > { %v1064_v11 = vld [vmem:[#allocation2 + $0x58] sm:$0x3] }
 0x1c2   : > { %391 = vrot.lane.b32.xlu1 %v1064_v11, %s834_s28 }
 0x1c3   : > { %417 = vrot.lane.b32.xlu0 %v1017_v57, %s832_s17 }
 0x1c6   : > { %419 = vrot.lane.b32.xlu1 %v346_v60, %s832_s17 }
 0x1c7   : > { %421 = vrot.lane.b32.xlu0 %v347_v61, %s832_s17 }
 0x1ca   : > { %423 = vrot.lane.b32.xlu1 %v1027_v0, %s832_s17 }
 0x1cb   : > { %425 = vrot.lane.b32.xlu0 %v1029_v1, %s832_s17 }
 0x1ce   : > { %427 = vrot.lane.b32.xlu1 %v1037_v4, %s832_s17 }
 0x1cf   : > { %429 = vrot.lane.b32.xlu0 %v1039_v5, %s832_s17 }
 0x1d2   : > { %431 = vrot.lane.b32.xlu1 %v1047_v7, %s832_s17 }
 0x1d3   : > { %433 = vrot.lane.b32.xlu0 %v1049_v8, %s832_s17 }
 0x1d6   : > { %435 = vrot.lane.b32.xlu1 %v1056_v9, %s832_s17 }
 0x1d7   : > { %437 = vrot.lane.b32.xlu0 %v1058_v10, %s832_s17 }
 0x1da   : > { %439 = vrot.lane.b32.xlu1 %v1064_v11, %s832_s17 }
 0x21d   : > { %v370_v12 = vpop.permute.xlu0 %369 }
 0x21e   : > { %v405_v23 = vadd.f32 %v370_v12, %v1017_v57 }
 0x220   : > { %v372_v13 = vpop.permute.xlu1 %371 }
 0x221   : > { %v374_v14 = vpop.permute.xlu0 %373  ;;  %v406_v27 = vadd.f32 %v372_v13, %v346_v60 }
 0x222   : > { %v407_v28 = vadd.f32 %v374_v14, %v347_v61 }
 0x224   : > { %v376_v15 = vpop.permute.xlu1 %375 }
 0x225   : > { %v378_v16 = vpop.permute.xlu0 %377  ;;  %v408_v38 = vadd.f32 %v376_v15, %v1027_v0 }
 0x226   : > { %v409_v39 = vadd.f32 %v378_v16, %v1029_v1 }
 0x228   : > { %v380_v17 = vpop.permute.xlu1 %379 }
 0x229   : > { %v382_v18 = vpop.permute.xlu0 %381  ;;  %v410_v49 = vadd.f32 %v380_v17, %v1037_v4 }
 0x22a   : > { %v411_v52 = vadd.f32 %v382_v18, %v1039_v5 }
 0x22c   : > { %v384_v19 = vpop.permute.xlu1 %383 }
 0x22d   : > { %v386_v20 = vpop.permute.xlu0 %385  ;;  %v412_v62 = vadd.f32 %v384_v19, %v1047_v7 }
 0x22e   : > { %v413_v2 = vadd.f32 %v386_v20, %v1049_v8 }
 0x230   : > { %v1090_v21 = vpop.permute.xlu1 %387 }
 0x231   : > { %v1092_v22 = vpop.permute.xlu0 %389 }
 0x234   : > { %v1095_v24 = vpop.permute.xlu1 %391 }
 0x235   : > { %v418_v25 = vpop.permute.xlu0 %417 }
 0x236   : > { %v453_v26 = vadd.f32 %v418_v25, %v405_v23 }
 0x238   : > { %v420_v29 = vpop.permute.xlu1 %419  ;;  %v478_v33 = vrot.slane %v453_v26, 1  ;;  %v515_v42 = vrot.slane %v453_v26, 2 }
 0x239   : > { %v422_v30 = vpop.permute.xlu0 %421  ;;  %v454_v31 = vadd.f32 %v420_v29, %v406_v27  ;;  %v414_v27 = vadd.f32 %v1090_v21, %v1056_v9  ;;  %v416_v9 = vadd.f32 %v1095_v24, %v1064_v11 }
 0x23a   : > { %v455_v32 = vadd.f32 %v422_v30, %v407_v28 }
 0x23b   : > { %v479_v34 = vrot.slane %v454_v31, 1  ;;  %v516_v35 = vrot.slane %v454_v31, 2 }
 0x23c   : > { %v481_v36 = vrot.slane %v455_v32, 1  ;;  %v518_v37 = vrot.slane %v455_v32, 2  ;;  %v424_v40 = vpop.permute.xlu1 %423  ;;  %v415_v32 = vadd.f32 %v1092_v22, %v1058_v10 }
 0x23d   : > { %v426_v41 = vpop.permute.xlu0 %425  ;;  %v480_v43 = vsel %vm477_vm7, %v478_v33, %v479_v34  ;;  %v456_v47 = vadd.f32 %v424_v40, %v408_v38  ;;  %v517_v50 = vsel %vm514_vm8, %v515_v42, %v516_v35 }
 0x23e   : > { %v482_v44 = vsel %vm477_vm7, %v479_v34, %v481_v36  ;;  %v506_v45 = vadd.f32 %v480_v43, %v453_v26  ;;  %v457_v48 = vadd.f32 %v426_v41, %v409_v39  ;;  %v519_v51 = vsel %vm514_vm8, %v516_v35, %v518_v37 }
 0x23f   : > { %v507_v46 = vadd.f32 %v482_v44, %v454_v31  ;;  %v483_v55 = vrot.slane %v456_v47, 1  ;;  %v520_v58 = vrot.slane %v456_v47, 2 }
 0x240   : > { %v543_v53 = vadd.f32 %v517_v50, %v506_v45  ;;  %v428_v56 = vpop.permute.xlu1 %427  ;;  %v484_v59 = vrot.slane %v457_v48, 1  ;;  %v521_v60 = vrot.slane %v457_v48, 2 }
 0x241   : > { %v544_v54 = vadd.f32 %v519_v51, %v507_v46  ;;  %v430_v57 = vpop.permute.xlu0 %429  ;;  %v458_v61 = vadd.f32 %v428_v56, %v410_v49 }
 0x242   : > { %v551_v63 = vmul.f32 0.11111111, %v543_v53  ;;  %v459_v1 = vadd.f32 %v430_v57, %v411_v52  ;;  %v485_v3 = vsel %vm477_vm7, %v483_v55, %v484_v59  ;;  %v522_v13 = vsel %vm514_vm8, %v520_v58, %v521_v60 }
 0x243   : > { %v552_v0 = vmul.f32 0.11111111, %v544_v54  ;;  %v486_v4 = vrot.slane %v458_v61, 1  ;;  %v523_v5 = vrot.slane %v458_v61, 2  ;;  %v508_v6 = vadd.f32 %v485_v3, %v456_v47 }
 0x244   : > { %560 = vst.msk [vmem:[%s1110_s29] sm:$0xff] %vm559_vm9, %v551_v63  ;;  %v432_v7 = vpop.permute.xlu1 %431  ;;  %v488_v19 = vrot.slane %v459_v1, 1  ;;  %v525_v33 = vrot.slane %v459_v1, 2 }
 0x245   : > { %561 = vst.msk [vmem:[%s1110_s29 + $0x8] sm:$0xff] %vm559_vm9, %v552_v0  ;;  %v434_v12 = vpop.permute.xlu0 %433  ;;  %v487_v8 = vsel %vm477_vm7, %v484_v59, %v486_v4  ;;  %v460_v14 = vadd.f32 %v432_v7, %v412_v62  ;;  %v545_v16 = vadd.f32 %v522_v13, %v508_v6  ;;  %v524_v18 = vsel %vm514_vm8, %v521_v60, %v523_v5 }
 0x246   : > { %v461_v15 = vadd.f32 %v434_v12, %v413_v2  ;;  %v509_v17 = vadd.f32 %v487_v8, %v457_v48 }
 0x247   : > { %v489_v20 = vrot.slane %v460_v14, 1  ;;  %v526_v23 = vrot.slane %v460_v14, 2  ;;  %v553_v28 = vmul.f32 0.11111111, %v545_v16 }
 0x248   : > { %v491_v25 = vrot.slane %v461_v15, 1  ;;  %v528_v26 = vrot.slane %v461_v15, 2  ;;  %v546_v29 = vadd.f32 %v524_v18, %v509_v17  ;;  %v436_v30 = vpop.permute.xlu1 %435 }
 0x249   : > { %v438_v31 = vpop.permute.xlu0 %437  ;;  %v490_v34 = vsel %vm477_vm7, %v488_v19, %v489_v20  ;;  %562 = vst.msk [vmem:[%s1110_s29 + $0x10] sm:$0xff] %vm559_vm9, %v553_v28  ;;  %v462_v39 = vadd.f32 %v436_v30, %v414_v27  ;;  %v527_v21 = vsel %vm514_vm8, %v525_v33, %v526_v23 }
 0x24a   : > { %v492_v35 = vsel %vm477_vm7, %v489_v20, %v491_v25  ;;  %v554_v36 = vmul.f32 0.11111111, %v546_v29  ;;  %v510_v37 = vadd.f32 %v490_v34, %v459_v1  ;;  %v529_v40 = vsel %vm514_vm8, %v526_v23, %v528_v26 }
 0x24b   : > { %v511_v38 = vadd.f32 %v492_v35, %v460_v14  ;;  %v463_v10 = vadd.f32 %v438_v31, %v415_v32  ;;  %v493_v42 = vrot.slane %v462_v39, 1  ;;  %v530_v44 = vrot.slane %v462_v39, 2 }
 0x24c   : > { %563 = vst.msk [vmem:[%s1110_s29 + $0x18] sm:$0xff] %vm559_vm9, %v554_v36  ;;  %v547_v22 = vadd.f32 %v527_v21, %v510_v37  ;;  %v440_v43 = vpop.permute.xlu1 %439 }
 0x24d   : > { %v548_v41 = vadd.f32 %v529_v40, %v511_v38  ;;  %v494_v45 = vrot.slane %v463_v10, 1  ;;  %v531_v46 = vrot.slane %v463_v10, 2  ;;  %v464_v47 = vadd.f32 %v440_v43, %v416_v9 }
 0x24e   : > { %v555_v11 = vmul.f32 0.11111111, %v547_v22 }
 0x24f   : > { %v556_v24 = vmul.f32 0.11111111, %v548_v41  ;;  %v495_v48 = vsel %vm477_vm7, %v493_v42, %v494_v45  ;;  %v496_v49 = vrot.slane %v464_v47, 1  ;;  %v533_v50 = vrot.slane %v464_v47, 2 }
 0x250   : > { %564 = vst.msk [vmem:[%s1110_s29 + $0x20] sm:$0xff] %vm559_vm9, %v555_v11  ;;  %v512_v51 = vadd.f32 %v495_v48, %v462_v39  ;;  %v532_v52 = vsel %vm514_vm8, %v530_v44, %v531_v46 }
 0x251   : > { %565 = vst.msk [vmem:[%s1110_s29 + $0x28] sm:$0xff] %vm559_vm9, %v556_v24  ;;  %v497_v53 = vsel %vm477_vm7, %v494_v45, %v496_v49  ;;  %v534_v56 = vsel %vm514_vm8, %v531_v46, %v533_v50 }
 0x252   : > { %v549_v54 = vadd.f32 %v532_v52, %v512_v51  ;;  %v513_v55 = vadd.f32 %v497_v53, %v463_v10 }
 0x254   : > { %v557_v57 = vmul.f32 0.11111111, %v549_v54  ;;  %v550_v58 = vadd.f32 %v534_v56, %v513_v55 }
 0x256   : > { %566 = vst.msk [vmem:[%s1110_s29 + $0x30] sm:$0xff] %vm559_vm9, %v557_v57  ;;  %v558_v59 = vmul.f32 0.11111111, %v550_v58 }
 0x258   : > { %567 = vst.msk [vmem:[%s1110_s29 + $0x38] sm:$0xff] %vm559_vm9, %v558_v59 }
 0x259   : > { %773 = shalt.err (!%p770_p2)
}
 0x25a   : > { %s774_s21 = scalar_lea.hbm %s1146_s11, 1024  ;;  %s778_s26 = scalar_lea.hbm %s1197_s1, 2048 }
 0x25b   : > { %p775_p4 = scmp.ne.s32.totalorder %s1146_s11, %s774_s21  ;;  %p779_p9 = scmp.lt.u32.totalorder %s1146_s11, %s1197_s1 }
 0x25c   : > { %p780_p1 = scmp.lt.u32.totalorder %s778_s26, %s774_s21  ;;  %p782_p6 = scmp.lt.u32.totalorder %s774_s21, %s1146_s11 }
 0x25d   : > { %p776_p5 = pnand %p775_p4, %p1204_p11 }
 0x25e   : > { %p781_p3 = por %p780_p1, %p779_p9 }
 0x25f   : > { %p777_p7 = pneg %p776_p5 }
 0x260   : > { %p783_p12 = por %p782_p6, %p781_p3 }
 0x262   : > { %p784_p13 = pnand %p783_p12, %p777_p7 }
 0x264   : > { %787 = shalt.err (!%p784_p13)
}
 0x265   : > { %s836_s17 = smov 128   ;;  %s837_s27 = smov 8  }
 0x266   : > { %678 = dma.vmem_to_hbm [thread:$0]  (%p1204_p11), %s1148_s3, 1024, %s1146_s11, %s569_s10, %s836_s17, %s836_s17, %s837_s27  }
 0x267 PF: > { %s598_s28 = sand.u32 1, %s814_s6   ;;  %p1205_p8 = scmp.ne.s32.totalorder %s1202_s19, 0 }
 0x268   : > { %p1206_p10 = scmp.ge.s32.totalorder %s826_s9, 2  ;;  %s599_s29 = scalar_lea.sflag [#allocation5], %s598_s28 }
 0x26a   : > { %p685_p0 = pnand %p1206_p10, %p1205_p8 }
 0x26c   : > { %809 = dma.done.wait (!%p685_p0), %s599_s29, 1024  }
 0x26d   : > { %811 = vsyncadd (!%p685_p0), %s599_s29, 4294966272  ;;  %p14_p2 = scmp.ge.s32.totalorder %s873_s12, 4   ;;  %s1207_s6 = smov %s818_s7 }
 0x26e   : > { %s1208_s7 = smov %s822_s8  ;;  %s1209_s8 = smov %s885_s15 }
 0x26f   : > { %s1210_s9 = smov %s873_s12  ;;  %16 = sbr.rel (!%p14_p2) target bundleno = 5 (0x5), region = 69 }
 0x276   :  { %604 = vsyncpa [#allocation4], 1 }
 0x277   :  { %606 = vsyncpa [#allocation4 + $0x1], 1 }
 0x278   :  { %607 = vsyncpa [#allocation5], 1 }
 0x279   :  { %609 = vsyncpa [#allocation5 + $0x1], 1 }

</bundles_post_ra>
